<compile_context>
chip_gen: v7x
topology: tpu7x:2x2x1
jax: 0.10.0
libtpu: 0.0.40
codegen_flags: <defaults>
</compile_context>

<pallas_src>
import functools

import jax
import jax.numpy as jnp
import numpy as np
from jax import lax
from jax.experimental import pallas as pl
from jax.experimental.pallas import tpu as pltpu

_EPS = 1e-5          # PyTorch InstanceNorm1d default eps
_LANE = 128


def _round_up(v, m):
    return (v + m - 1) // m * m


def _gelu_tanh(x):
    # tanh-approximate GELU (transcendental routed to the EUP slot)
    c = np.float32(np.sqrt(2.0 / np.pi))
    return 0.5 * x * (1.0 + jnp.tanh(c * (x + np.float32(0.044715) * x * x * x)))


def _gelu_exact(x):
    # erf-based GELU (torch nn.GELU() default) -- used only by the XLA reference
    return 0.5 * x * (1.0 + lax.erf(x * np.float32(1.0 / np.sqrt(2.0))))


# ------------------------------ kernel 1: attention ------------------------------
def _attn_kernel(num_heads, hw_true, tile_hw, mask_rows,
                 qn_ref, kt_ref, v_ref, brow_ref, wao_ref, bao_ref,
                 a_ref, asum_ref, asq_ref):
    t = pl.program_id(1)
    f32 = jnp.float32

    qn = qn_ref[0]                                     # (TILE, KCP) bf16 (normalized q)
    brow = brow_ref[0]                                 # (1, NLP) f32  (10000*m - 10000)
    vcp = a_ref.shape[-1]

    acc = jnp.zeros((tile_hw, vcp), f32)
    for h in range(num_heads):                         # static unroll
        kt = kt_ref[0, h]                              # (KCP, NLP) bf16, kc^-0.5 folded in
        v = v_ref[0, h]                                # (NLP, VCP) bf16, head cols only
        logits = jnp.dot(qn, kt, preferred_element_type=f32) + brow    # (TILE, NLP)
        logits = logits - jnp.max(logits, axis=-1, keepdims=True)
        p = jnp.exp(logits)
        p = p * pl.reciprocal(jnp.sum(p, axis=-1, keepdims=True), approx=True)
        # head concat == sum: each head's value columns are disjoint in VCP
        acc = acc + jnp.dot(p.astype(jnp.bfloat16), v, preferred_element_type=f32)

    a = (jnp.dot(acc.astype(jnp.bfloat16), wao_ref[...], preferred_element_type=f32)
         + bao_ref[...])                               # (TILE, VCP) un-normalized
    a_ref[0] = a.astype(a_ref.dtype)

    # InstanceNorm statistics over true HW (accumulated across tiles per batch)
    if mask_rows:
        rows = lax.broadcasted_iota(jnp.int32, (tile_hw, 1), 0) + t * tile_hw
        m = (rows < hw_true).astype(f32)
        am = a * m
        s = jnp.sum(am, axis=0, keepdims=True)
        ss = jnp.sum(a * am, axis=0, keepdims=True)
    else:
        s = jnp.sum(a, axis=0, keepdims=True)
        ss = jnp.sum(a * a, axis=0, keepdims=True)

    @pl.when(t == 0)
    def _():
        asum_ref[...] = jnp.zeros_like(asum_ref)
        asq_ref[...] = jnp.zeros_like(asq_ref)

    asum_ref[0] = asum_ref[0] + s
    asq_ref[0] = asq_ref[0] + ss


# ------------------------------ kernel 2: fuse / output ------------------------------
def _fuse_kernel(hw_true,
                 x_ref, a_ref, asum_ref, asq_ref,
                 wvp_ref, bvp_ref, wo_ref, bo_ref, o_ref):
    f32 = jnp.float32
    inv_hw = np.float32(1.0 / hw_true)

    mean = asum_ref[0] * inv_hw                                     # (1, VCP)
    var = jnp.maximum(asq_ref[0] * inv_hw - mean * mean, 0.0)
    att = (a_ref[0].astype(f32) - mean) * lax.rsqrt(var + _EPS)     # (TILE, VCP)

    vis = _gelu_tanh(jnp.dot(x_ref[0], wvp_ref[...], preferred_element_type=f32)
                     + bvp_ref[...])                                # (TILE, VCP)
    fused = (vis * att).astype(jnp.bfloat16)
    out = _gelu_tanh(jnp.dot(fused, wo_ref[...], preferred_element_type=f32)
                     + bo_ref[...])
    o_ref[0] = out.astype(o_ref.dtype)


# ------------------------------------ wrapper ------------------------------------
def pwam_forward(x, l, l_mask, params, *, num_heads):
    """x: (B, HW, dim), l: (B, l_in, N_l), l_mask: (B, N_l, 1) -> (B, HW, value_channels)."""
    B, HW, dim = x.shape
    N_l = l.shape[2]
    kc = params["wq"].shape[0]
    vc = params["wv"].shape[0]
    assert dim == vc, "PWAM requires dim == value_channels (vis * att elementwise mul)"
    assert kc % num_heads == 0 and vc % num_heads == 0
    dk, dv = kc // num_heads, vc // num_heads

    DIMP = _round_up(dim, _LANE)
    KCP = _round_up(kc, _LANE)
    VCP = _round_up(vc, _LANE)
    NLP = _round_up(N_l, _LANE)

    TILE = min(1024, _round_up(HW, 16))       # large tiles amortize per-step overhead
    HWP = _round_up(HW, TILE)
    n_tiles = HWP // TILE
    mask_rows = HWP != HW

    f32, bf16 = jnp.float32, jnp.bfloat16

    x32 = x.astype(f32)
    l_nlc = jnp.transpose(l.astype(f32), (0, 2, 1))                 # (B, N_l, l_in)
    mcol = l_mask.astype(f32)                                       # (B, N_l, 1)

    wq = jnp.asarray(params["wq"]).astype(f32)
    bq = jnp.asarray(params["bq"]).astype(f32)
    wk = jnp.asarray(params["wk"]).astype(f32)
    bk = jnp.asarray(params["bk"]).astype(f32)
    wv_ = jnp.asarray(params["wv"]).astype(f32)
    bv = jnp.asarray(params["bv"]).astype(f32)

    # --- query projection + InstanceNorm over HW (two-pass, f32, in XLA) --------
    q = jnp.einsum('bnd,kd->bnk', x32, wq) + bq                     # (B, HW, kc)
    qm = jnp.mean(q, axis=1, keepdims=True)
    qv = jnp.mean(jnp.square(q - qm), axis=1, keepdims=True)        # biased, like torch
    qn = (q - qm) * lax.rsqrt(qv + _EPS)

    # --- key / value projections: once per batch, not per HW tile ----------------
    scale = np.float32(kc ** (-0.5))
    k = (jnp.einsum('bnd,kd->bnk', l_nlc, wk) + bk) * mcol * scale  # scale folded into k
    v = (jnp.einsum('bnd,kd->bnk', l_nlc, wv_) + bv) * mcol

    # --- pad + zero-embed heads into full lane-padded slabs ----------------------
    qn_p = jnp.pad(qn, ((0, 0), (0, HWP - HW), (0, KCP - kc))).astype(bf16)
    k_p = jnp.pad(k, ((0, 0), (0, NLP - N_l), (0, KCP - kc)))
    v_p = jnp.pad(v, ((0, 0), (0, NLP - N_l), (0, VCP - vc)))

    def head_embed(a_p, d_head, n_valid):
        # (B, NLP, CP) -> (B, H, NLP, CP); head h keeps only its own columns, so the
        # kernel needs no slicing and the head concat becomes a plain sum.
        cp = a_p.shape[-1]
        cols = jnp.arange(cp)
        msk = ((cols[None, :] // d_head == jnp.arange(num_heads)[:, None])
               & (cols[None, :] < n_valid))
        return a_p[:, None, :, :] * msk[None, :, None, :].astype(f32)

    kt_heads = jnp.transpose(head_embed(k_p, dk, kc), (0, 1, 3, 2)).astype(bf16)  # (B,H,KCP,NLP)
    v_heads = head_embed(v_p, dv, vc).astype(bf16)                                # (B,H,NLP,VCP)

    mcolp = jnp.pad(mcol, ((0, 0), (0, NLP - N_l), (0, 0)))
    brow = 10000.0 * jnp.transpose(mcolp, (0, 2, 1)) - 10000.0      # (B, 1, NLP) f32

    x_p = jnp.pad(x32, ((0, 0), (0, HWP - HW), (0, DIMP - dim))).astype(bf16)

    def pad2(a, r, c):
        return jnp.pad(a, ((0, r - a.shape[0]), (0, c - a.shape[1])))

    # conv1d weights (C_out, C_in) -> lane-padded (C_in, C_out), bf16
    wao = pad2(jnp.asarray(params["wao"]).astype(f32).T, VCP, VCP).astype(bf16)
    bao = jnp.pad(jnp.asarray(params["bao"]).astype(f32), (0, VCP - vc)).reshape(1, -1)
    wvp = pad2(jnp.asarray(params["wvp"]).astype(f32).T, DIMP, VCP).astype(bf16)
    bvp = jnp.pad(jnp.asarray(params["bvp"]).astype(f32), (0, VCP - vc)).reshape(1, -1)
    wo = pad2(jnp.asarray(params["wo"]).astype(f32).T, VCP, VCP).astype(bf16)
    bo = jnp.pad(jnp.asarray(params["bo"]).astype(f32), (0, VCP - vc)).reshape(1, -1)

    def full_spec(a):
        nd = a.ndim
        return pl.BlockSpec(a.shape, lambda b, t, _nd=nd: (0,) * _nd)

    # ------------- kernel 1: attention + VLA out-projection + IN stats ----------
    a_buf, asum, asq = pl.pallas_call(
        functools.partial(_attn_kernel, num_heads, HW, TILE, mask_rows),
        out_shape=(jax.ShapeDtypeStruct((B, HWP, VCP), bf16),
                   jax.ShapeDtypeStruct((B, 1, VCP), f32),
                   jax.ShapeDtypeStruct((B, 1, VCP), f32)),
        grid_spec=pltpu.PrefetchScalarGridSpec(
            num_scalar_prefetch=0,
            grid=(B, n_tiles),
            in_specs=[
                pl.BlockSpec((1, TILE, KCP), lambda b, t: (b, t, 0)),
                pl.BlockSpec((1, num_heads, KCP, NLP), lambda b, t: (b, 0, 0, 0)),
                pl.BlockSpec((1, num_heads, NLP, VCP), lambda b, t: (b, 0, 0, 0)),
                pl.BlockSpec((1, 1, NLP), lambda b, t: (b, 0, 0)),
                full_spec(wao), full_spec(bao),
            ],
            out_specs=[
                pl.BlockSpec((1, TILE, VCP), lambda b, t: (b, t, 0)),
                pl.BlockSpec((1, 1, VCP), lambda b, t: (b, 0, 0)),
                pl.BlockSpec((1, 1, VCP), lambda b, t: (b, 0, 0)),
            ]),
        compiler_params=pltpu.CompilerParams(
            dimension_semantics=("parallel", "arbitrary"),
            vmem_limit_bytes=32 * 1024 * 1024),
    )(qn_p, kt_heads, v_heads, brow, wao, bao)

    # ------------- kernel 2: InstanceNorm(A) * gelu(vis) -> out-project ---------
    out = pl.pallas_call(
        functools.partial(_fuse_kernel, HW),
        out_shape=jax.ShapeDtypeStruct((B, HWP, VCP), jnp.float32),
        grid_spec=pltpu.PrefetchScalarGridSpec(
            num_scalar_prefetch=0,
            grid=(B, n_tiles),
            in_specs=[
                pl.BlockSpec((1, TILE, DIMP), lambda b, t: (b, t, 0)),
                pl.BlockSpec((1, TILE, VCP), lambda b, t: (b, t, 0)),
                pl.BlockSpec((1, 1, VCP), lambda b, t: (b, 0, 0)),
                pl.BlockSpec((1, 1, VCP), lambda b, t: (b, 0, 0)),
                full_spec(wvp), full_spec(bvp), full_spec(wo), full_spec(bo),
            ],
            out_specs=pl.BlockSpec((1, TILE, VCP), lambda b, t: (b, t, 0))),
        compiler_params=pltpu.CompilerParams(
            dimension_semantics=("parallel", "parallel"),
            vmem_limit_bytes=32 * 1024 * 1024),
    )(x_p, a_buf, asum, asq, wvp, bvp, wo, bo)

    return out[:, :HW, :vc]


# ----------------------------- pure-JAX reference -----------------------------
def _instance_norm_rows(x):
    mean = jnp.mean(x, axis=0, keepdims=True)
    var = jnp.mean((x - mean) ** 2, axis=0, keepdims=True)   # biased var, like torch
    return (x - mean) * lax.rsqrt(var + _EPS)


def pwam_reference(x, l, l_mask, params, *, num_heads):
    l_nlc = jnp.transpose(l, (0, 2, 1))
    mask_col = l_mask.astype(jnp.float32)
    mask_row = jnp.transpose(mask_col, (0, 2, 1))
    kc = params["wq"].shape[0]
    vc = params["wv"].shape[0]
    dk, dv = kc // num_heads, vc // num_heads

    def one(xb, lb, mcb, mrb):
        vis = _gelu_exact(xb @ params["wvp"].T + params["bvp"])
        q = _instance_norm_rows(xb @ params["wq"].T + params["bq"])
        k = (lb @ params["wk"].T + params["bk"]) * mcb
        v = (lb @ params["wv"].T + params["bv"]) * mcb
        outs = []
        for h in range(num_heads):
            att = (q[:, h * dk:(h + 1) * dk] @ k[:, h * dk:(h + 1) * dk].T) * kc ** -0.5
            att = att + (10000.0 * mrb - 10000.0)
            att = jax.nn.softmax(att, axis=-1)
            outs.append(att @ v[:, h * dv:(h + 1) * dv])
        a = jnp.concatenate(outs, axis=-1)
        a = _instance_norm_rows(a @ params["wao"].T + params["bao"])
        return _gelu_exact((vis * a) @ params["wo"].T + params["bo"])

    return jax.vmap(one)(x.astype(jnp.float32), l_nlc.astype(jnp.float32),
                         mask_col, mask_row)


# ----------------------------------- main --------------------------------------
if __name__ == "__main__":
    B, H, W = 2, 4, 4
    HW = H * W
    dim = 32                 # == v_in_channels == value_channels (required by vis*att mul)
    v_in_channels = dim
    l_in_channels = 24
    key_channels = 32
    value_channels = dim
    num_heads = 2
    N_l = 8

    key = jax.random.PRNGKey(0)
    ks = jax.random.split(key, 16)

    def init_w(k, co, ci):
        return 0.1 * jax.random.normal(k, (co, ci), jnp.float32)

    def init_b(k, co):
        return 0.05 * jax.random.normal(k, (co,), jnp.float32)

    params = {
        "wvp": init_w(ks[0], dim, dim),                       "bvp": init_b(ks[1], dim),
        "wq":  init_w(ks[2], key_channels, v_in_channels),    "bq":  init_b(ks[3], key_channels),
        "wk":  init_w(ks[4], key_channels, l_in_channels),    "bk":  init_b(ks[5], key_channels),
        "wv":  init_w(ks[6], value_channels, l_in_channels),  "bv":  init_b(ks[7], value_channels),
        "wao": init_w(ks[8], value_channels, value_channels), "bao": init_b(ks[9], value_channels),
        "wo":  init_w(ks[10], value_channels, value_channels),"bo":  init_b(ks[11], value_channels),
    }

    x = jax.random.normal(ks[12], (B, HW, dim), jnp.float32)
    l = jax.random.normal(ks[13], (B, l_in_channels, N_l), jnp.float32)
    # mask: first few language tokens valid
    valid = jnp.array([5, 7], dtype=jnp.int32)
    l_mask = (jnp.arange(N_l)[None, :] < valid[:, None]).astype(jnp.float32)[..., None]  # (B, N_l, 1)

    out = pwam_forward(x, l, l_mask, params, num_heads=num_heads)
    out = jax.block_until_ready(out)

    ref = jax.block_until_ready(pwam_reference(x, l, l_mask, params, num_heads=num_heads))
    # bf16 matmul operands + approx reciprocal + tanh-GELU => small tolerance budget
    np.testing.assert_allclose(np.asarray(out), np.asarray(ref), rtol=5e-2, atol=2e-2)

    print("KERNEL_OK")
</pallas_src>

<mosaic_0001>
module attributes {stable_mosaic.version = 11 : i64} {
  func.func @_attn_kernel(%arg0: i32, %arg1: i32, %arg2: memref<1x16x128xbf16, #tpu.memory_space<vmem>>, %arg3: memref<1x2x128x128xbf16, #tpu.memory_space<vmem>>, %arg4: memref<1x2x128x128xbf16, #tpu.memory_space<vmem>>, %arg5: memref<1x1x128xf32, #tpu.memory_space<vmem>>, %arg6: memref<128x128xbf16, #tpu.memory_space<vmem>>, %arg7: memref<1x128xf32, #tpu.memory_space<vmem>>, %arg8: memref<1x16x128xbf16, #tpu.memory_space<vmem>>, %arg9: memref<1x1x128xf32, #tpu.memory_space<vmem>>, %arg10: memref<1x1x128xf32, #tpu.memory_space<vmem>>) attributes {dimension_semantics = [#tpu.dimension_semantics<parallel>, #tpu.dimension_semantics<arbitrary>], iteration_bounds = array<i64: 2, 1>, scalar_prefetch = 0 : i64, scratch_operands = 0 : i64, tpu.core_type = #tpu.core_type<tc>, window_params = [{transform_indices = @transform_0, window_bounds = array<i64: 1, 16, 128>}, {transform_indices = @transform_1, window_bounds = array<i64: 1, 2, 128, 128>}, {transform_indices = @transform_2, window_bounds = array<i64: 1, 2, 128, 128>}, {transform_indices = @transform_3, window_bounds = array<i64: 1, 1, 128>}, {pipeline_mode = #tpu.pipeline_mode<synchronous>, transform_indices = @transform_4, window_bounds = array<i64: 128, 128>}, {pipeline_mode = #tpu.pipeline_mode<synchronous>, transform_indices = @transform_5, window_bounds = array<i64: 1, 128>}, {transform_indices = @transform_6, window_bounds = array<i64: 1, 16, 128>}, {transform_indices = @transform_7, window_bounds = array<i64: 1, 1, 128>}, {transform_indices = @transform_8, window_bounds = array<i64: 1, 1, 128>}]} {
    %c0 = arith.constant 0 : index
    %c0_0 = arith.constant 0 : index
    %c0_1 = arith.constant 0 : index
    %0 = vector.load %arg2[%c0, %c0_0, %c0_1] : memref<1x16x128xbf16, #tpu.memory_space<vmem>>, vector<1x16x128xbf16>
    %1 = vector.shape_cast %0 : vector<1x16x128xbf16> to vector<16x128xbf16>
    %c0_2 = arith.constant 0 : index
    %c0_3 = arith.constant 0 : index
    %c0_4 = arith.constant 0 : index
    %2 = vector.load %arg5[%c0_2, %c0_3, %c0_4] : memref<1x1x128xf32, #tpu.memory_space<vmem>>, vector<1x1x128xf32>
    %3 = vector.shape_cast %2 : vector<1x1x128xf32> to vector<1x128xf32>
    %cst = arith.constant 0.000000e+00 : f32
    %4 = vector.broadcast %cst : f32 to vector<16x128xf32>
    %c0_5 = arith.constant 0 : index
    %c0_6 = arith.constant 0 : index
    %c0_7 = arith.constant 0 : index
    %c0_8 = arith.constant 0 : index
    %5 = vector.load %arg3[%c0_5, %c0_6, %c0_7, %c0_8] : memref<1x2x128x128xbf16, #tpu.memory_space<vmem>>, vector<1x1x128x128xbf16>
    %6 = vector.shape_cast %5 : vector<1x1x128x128xbf16> to vector<128x128xbf16>
    %c0_9 = arith.constant 0 : index
    %c0_10 = arith.constant 0 : index
    %c0_11 = arith.constant 0 : index
    %c0_12 = arith.constant 0 : index
    %7 = vector.load %arg4[%c0_9, %c0_10, %c0_11, %c0_12] : memref<1x2x128x128xbf16, #tpu.memory_space<vmem>>, vector<1x1x128x128xbf16>
    %8 = vector.shape_cast %7 : vector<1x1x128x128xbf16> to vector<128x128xbf16>
    %cst_13 = arith.constant dense<0.000000e+00> : vector<16x128xf32>
    %9 = tpu.matmul %1, %6, %cst_13 {dimension_numbers = #tpu.dot_dimension_numbers<[1], [0], [0], [1], [0, 0, 1, 1], [], []>} : vector<16x128xbf16>, vector<128x128xbf16>, vector<16x128xf32> -> vector<16x128xf32>
    %10 = vector.broadcast %3 : vector<1x128xf32> to vector<16x128xf32>
    %11 = arith.addf %9, %10 : vector<16x128xf32>
    %cst_14 = arith.constant dense<0xFF800000> : vector<16xf32>
    %12 = vector.multi_reduction <maximumf>, %11, %cst_14 [1] : vector<16x128xf32> to vector<16xf32>
    %13 = vector.shape_cast %12 : vector<16xf32> to vector<16x1xf32>
    %14 = vector.broadcast %13 : vector<16x1xf32> to vector<16x128xf32>
    %15 = arith.subf %11, %14 : vector<16x128xf32>
    %16 = math.exp %15 : vector<16x128xf32>
    %cst_15 = arith.constant dense<0.000000e+00> : vector<16xf32>
    %17 = vector.multi_reduction <add>, %16, %cst_15 [1] : vector<16x128xf32> to vector<16xf32>
    %18 = vector.shape_cast %17 : vector<16xf32> to vector<16x1xf32>
    %19 = tpu.reciprocal %18 {approx = true} : vector<16x1xf32> -> vector<16x1xf32>
    %20 = vector.broadcast %19 : vector<16x1xf32> to vector<16x128xf32>
    %21 = arith.mulf %16, %20 : vector<16x128xf32>
    %22 = arith.truncf %21 : vector<16x128xf32> to vector<16x128xbf16>
    %cst_16 = arith.constant dense<0.000000e+00> : vector<16x128xf32>
    %23 = tpu.matmul %22, %8, %cst_16 {dimension_numbers = #tpu.dot_dimension_numbers<[1], [0], [0], [1], [0, 0, 1, 1], [], []>} : vector<16x128xbf16>, vector<128x128xbf16>, vector<16x128xf32> -> vector<16x128xf32>
    %24 = arith.addf %4, %23 : vector<16x128xf32>
    %c0_17 = arith.constant 0 : index
    %c1 = arith.constant 1 : index
    %c0_18 = arith.constant 0 : index
    %c0_19 = arith.constant 0 : index
    %25 = vector.load %arg3[%c0_17, %c1, %c0_18, %c0_19] : memref<1x2x128x128xbf16, #tpu.memory_space<vmem>>, vector<1x1x128x128xbf16>
    %26 = vector.shape_cast %25 : vector<1x1x128x128xbf16> to vector<128x128xbf16>
    %c0_20 = arith.constant 0 : index
    %c1_21 = arith.constant 1 : index
    %c0_22 = arith.constant 0 : index
    %c0_23 = arith.constant 0 : index
    %27 = vector.load %arg4[%c0_20, %c1_21, %c0_22, %c0_23] : memref<1x2x128x128xbf16, #tpu.memory_space<vmem>>, vector<1x1x128x128xbf16>
    %28 = vector.shape_cast %27 : vector<1x1x128x128xbf16> to vector<128x128xbf16>
    %cst_24 = arith.constant dense<0.000000e+00> : vector<16x128xf32>
    %29 = tpu.matmul %1, %26, %cst_24 {dimension_numbers = #tpu.dot_dimension_numbers<[1], [0], [0], [1], [0, 0, 1, 1], [], []>} : vector<16x128xbf16>, vector<128x128xbf16>, vector<16x128xf32> -> vector<16x128xf32>
    %30 = vector.broadcast %3 : vector<1x128xf32> to vector<16x128xf32>
    %31 = arith.addf %29, %30 : vector<16x128xf32>
    %cst_25 = arith.constant dense<0xFF800000> : vector<16xf32>
    %32 = vector.multi_reduction <maximumf>, %31, %cst_25 [1] : vector<16x128xf32> to vector<16xf32>
    %33 = vector.shape_cast %32 : vector<16xf32> to vector<16x1xf32>
    %34 = vector.broadcast %33 : vector<16x1xf32> to vector<16x128xf32>
    %35 = arith.subf %31, %34 : vector<16x128xf32>
    %36 = math.exp %35 : vector<16x128xf32>
    %cst_26 = arith.constant dense<0.000000e+00> : vector<16xf32>
    %37 = vector.multi_reduction <add>, %36, %cst_26 [1] : vector<16x128xf32> to vector<16xf32>
    %38 = vector.shape_cast %37 : vector<16xf32> to vector<16x1xf32>
    %39 = tpu.reciprocal %38 {approx = true} : vector<16x1xf32> -> vector<16x1xf32>
    %40 = vector.broadcast %39 : vector<16x1xf32> to vector<16x128xf32>
    %41 = arith.mulf %36, %40 : vector<16x128xf32>
    %42 = arith.truncf %41 : vector<16x128xf32> to vector<16x128xbf16>
    %cst_27 = arith.constant dense<0.000000e+00> : vector<16x128xf32>
    %43 = tpu.matmul %42, %28, %cst_27 {dimension_numbers = #tpu.dot_dimension_numbers<[1], [0], [0], [1], [0, 0, 1, 1], [], []>} : vector<16x128xbf16>, vector<128x128xbf16>, vector<16x128xf32> -> vector<16x128xf32>
    %44 = arith.addf %24, %43 : vector<16x128xf32>
    %45 = arith.truncf %44 : vector<16x128xf32> to vector<16x128xbf16>
    %c0_28 = arith.constant 0 : index
    %c0_29 = arith.constant 0 : index
    %46 = vector.load %arg6[%c0_28, %c0_29] : memref<128x128xbf16, #tpu.memory_space<vmem>>, vector<128x128xbf16>
    %cst_30 = arith.constant dense<0.000000e+00> : vector<16x128xf32>
    %47 = tpu.matmul %45, %46, %cst_30 {dimension_numbers = #tpu.dot_dimension_numbers<[1], [0], [0], [1], [0, 0, 1, 1], [], []>} : vector<16x128xbf16>, vector<128x128xbf16>, vector<16x128xf32> -> vector<16x128xf32>
    %c0_31 = arith.constant 0 : index
    %c0_32 = arith.constant 0 : index
    %48 = vector.load %arg7[%c0_31, %c0_32] : memref<1x128xf32, #tpu.memory_space<vmem>>, vector<1x128xf32>
    %49 = vector.broadcast %48 : vector<1x128xf32> to vector<16x128xf32>
    %50 = arith.addf %47, %49 : vector<16x128xf32>
    %51 = arith.truncf %50 : vector<16x128xf32> to vector<16x128xbf16>
    %c0_33 = arith.constant 0 : index
    %c0_34 = arith.constant 0 : index
    %c0_35 = arith.constant 0 : index
    %52 = vector.load %arg8[%c0_33, %c0_34, %c0_35] : memref<1x16x128xbf16, #tpu.memory_space<vmem>>, vector<1x16x128xbf16>
    %53 = vector.shape_cast %52 : vector<1x16x128xbf16> to vector<16x128xbf16>
    %54 = vector.shape_cast %51 : vector<16x128xbf16> to vector<1x16x128xbf16>
    tpu.vector_store %arg8[%c0_33, %c0_34, %c0_35], %54 {strides = array<i32>} : memref<1x16x128xbf16, #tpu.memory_space<vmem>>, vector<1x16x128xbf16>,
    %cst_36 = arith.constant dense<0.000000e+00> : vector<128xf32>
    %55 = vector.multi_reduction <add>, %50, %cst_36 [0] : vector<16x128xf32> to vector<128xf32>
    %56 = vector.shape_cast %55 : vector<128xf32> to vector<1x128xf32>
    %57 = arith.mulf %50, %50 : vector<16x128xf32>
    %cst_37 = arith.constant dense<0.000000e+00> : vector<128xf32>
    %58 = vector.multi_reduction <add>, %57, %cst_37 [0] : vector<16x128xf32> to vector<128xf32>
    %59 = vector.shape_cast %58 : vector<128xf32> to vector<1x128xf32>
    %c0_i32 = arith.constant 0 : i32
    %60 = arith.cmpi eq, %arg1, %c0_i32 : i32
    %61 = arith.extui %60 : i1 to i32
    %c0_i32_38 = arith.constant 0 : i32
    %62 = arith.cmpi ne, %61, %c0_i32_38 : i32
    scf.if %62 {
      %cst_51 = arith.constant 0.000000e+00 : f32
      %75 = vector.broadcast %cst_51 : f32 to vector<1x1x128xf32>
      %c0_52 = arith.constant 0 : index
      %c0_53 = arith.constant 0 : index
      %c0_54 = arith.constant 0 : index
      %76 = vector.load %arg9[%c0_52, %c0_53, %c0_54] : memref<1x1x128xf32, #tpu.memory_space<vmem>>, vector<1x1x128xf32>
      tpu.vector_store %arg9[%c0_52, %c0_53, %c0_54], %75 {strides = array<i32>} : memref<1x1x128xf32, #tpu.memory_space<vmem>>, vector<1x1x128xf32>,
      %cst_55 = arith.constant 0.000000e+00 : f32
      %77 = vector.broadcast %cst_55 : f32 to vector<1x1x128xf32>
      %c0_56 = arith.constant 0 : index
      %c0_57 = arith.constant 0 : index
      %c0_58 = arith.constant 0 : index
      %78 = vector.load %arg10[%c0_56, %c0_57, %c0_58] : memref<1x1x128xf32, #tpu.memory_space<vmem>>, vector<1x1x128xf32>
      tpu.vector_store %arg10[%c0_56, %c0_57, %c0_58], %77 {strides = array<i32>} : memref<1x1x128xf32, #tpu.memory_space<vmem>>, vector<1x1x128xf32>,
    } else {
    }
    %c0_39 = arith.constant 0 : index
    %c0_40 = arith.constant 0 : index
    %c0_41 = arith.constant 0 : index
    %63 = vector.load %arg9[%c0_39, %c0_40, %c0_41] : memref<1x1x128xf32, #tpu.memory_space<vmem>>, vector<1x1x128xf32>
    %64 = vector.shape_cast %63 : vector<1x1x128xf32> to vector<1x128xf32>
    %65 = arith.addf %64, %56 : vector<1x128xf32>
    %c0_42 = arith.constant 0 : index
    %c0_43 = arith.constant 0 : index
    %c0_44 = arith.constant 0 : index
    %66 = vector.load %arg9[%c0_42, %c0_43, %c0_44] : memref<1x1x128xf32, #tpu.memory_space<vmem>>, vector<1x1x128xf32>
    %67 = vector.shape_cast %66 : vector<1x1x128xf32> to vector<1x128xf32>
    %68 = vector.shape_cast %65 : vector<1x128xf32> to vector<1x1x128xf32>
    tpu.vector_store %arg9[%c0_42, %c0_43, %c0_44], %68 {strides = array<i32>} : memref<1x1x128xf32, #tpu.memory_space<vmem>>, vector<1x1x128xf32>,
    %c0_45 = arith.constant 0 : index
    %c0_46 = arith.constant 0 : index
    %c0_47 = arith.constant 0 : index
    %69 = vector.load %arg10[%c0_45, %c0_46, %c0_47] : memref<1x1x128xf32, #tpu.memory_space<vmem>>, vector<1x1x128xf32>
    %70 = vector.shape_cast %69 : vector<1x1x128xf32> to vector<1x128xf32>
    %71 = arith.addf %70, %59 : vector<1x128xf32>
    %c0_48 = arith.constant 0 : index
    %c0_49 = arith.constant 0 : index
    %c0_50 = arith.constant 0 : index
    %72 = vector.load %arg10[%c0_48, %c0_49, %c0_50] : memref<1x1x128xf32, #tpu.memory_space<vmem>>, vector<1x1x128xf32>
    %73 = vector.shape_cast %72 : vector<1x1x128xf32> to vector<1x128xf32>
    %74 = vector.shape_cast %71 : vector<1x128xf32> to vector<1x1x128xf32>
    tpu.vector_store %arg10[%c0_48, %c0_49, %c0_50], %74 {strides = array<i32>} : memref<1x1x128xf32, #tpu.memory_space<vmem>>, vector<1x1x128xf32>,
    return
  }
  func.func @transform_0(%arg0: i32, %arg1: i32) -> (i32, i32, i32) {
    %c0_i32 = arith.constant 0 : i32
    %c0_i32_0 = arith.constant 0 : i32
    return %arg0, %arg1, %c0_i32 : i32, i32, i32
  }
  func.func @transform_1(%arg0: i32, %arg1: i32) -> (i32, i32, i32, i32) {
    %c0_i32 = arith.constant 0 : i32
    %c0_i32_0 = arith.constant 0 : i32
    %c0_i32_1 = arith.constant 0 : i32
    %c0_i32_2 = arith.constant 0 : i32
    return %arg0, %c0_i32, %c0_i32_0, %c0_i32_1 : i32, i32, i32, i32
  }
  func.func @transform_2(%arg0: i32, %arg1: i32) -> (i32, i32, i32, i32) {
    %c0_i32 = arith.constant 0 : i32
    %c0_i32_0 = arith.constant 0 : i32
    %c0_i32_1 = arith.constant 0 : i32
    %c0_i32_2 = arith.constant 0 : i32
    return %arg0, %c0_i32, %c0_i32_0, %c0_i32_1 : i32, i32, i32, i32
  }
  func.func @transform_3(%arg0: i32, %arg1: i32) -> (i32, i32, i32) {
    %c0_i32 = arith.constant 0 : i32
    %c0_i32_0 = arith.constant 0 : i32
    %c0_i32_1 = arith.constant 0 : i32
    return %arg0, %c0_i32, %c0_i32_0 : i32, i32, i32
  }
  func.func @transform_4(%arg0: i32, %arg1: i32) -> (i32, i32) {
    %c0_i32 = arith.constant 0 : i32
    %c0_i32_0 = arith.constant 0 : i32
    %c0_i32_1 = arith.constant 0 : i32
    return %c0_i32, %c0_i32_0 : i32, i32
  }
  func.func @transform_5(%arg0: i32, %arg1: i32) -> (i32, i32) {
    %c0_i32 = arith.constant 0 : i32
    %c0_i32_0 = arith.constant 0 : i32
    %c0_i32_1 = arith.constant 0 : i32
    return %c0_i32, %c0_i32_0 : i32, i32
  }
  func.func @transform_6(%arg0: i32, %arg1: i32) -> (i32, i32, i32) {
    %c0_i32 = arith.constant 0 : i32
    %c0_i32_0 = arith.constant 0 : i32
    return %arg0, %arg1, %c0_i32 : i32, i32, i32
  }
  func.func @transform_7(%arg0: i32, %arg1: i32) -> (i32, i32, i32) {
    %c0_i32 = arith.constant 0 : i32
    %c0_i32_0 = arith.constant 0 : i32
    %c0_i32_1 = arith.constant 0 : i32
    return %arg0, %c0_i32, %c0_i32_0 : i32, i32, i32
  }
  func.func @transform_8(%arg0: i32, %arg1: i32) -> (i32, i32, i32) {
    %c0_i32 = arith.constant 0 : i32
    %c0_i32_0 = arith.constant 0 : i32
    %c0_i32_1 = arith.constant 0 : i32
    return %arg0, %c0_i32, %c0_i32_0 : i32, i32, i32
  }
}

</mosaic_0001>

<bundles_post_ra>
// kernel: tpu_custom_call.1
= control target key start
LH: loop header
LB: loop body
LE: loop exit
PB: predicated region body
PF: predicated region fallthrough
CT: control target
= control target key end

     0   :  { %s2601_s0 = inlined_call_operand.hbm [shape: bf16[2,16,128], index: 0, kind: input, shape index: {}]   ;;  %s2602_s1 = inlined_call_operand.hbm [shape: bf16[2,2,128,128], index: 1, kind: input, shape index: {}]   ;;  %s2603_s2 = inlined_call_operand.hbm [shape: bf16[2,2,128,128], index: 2, kind: input, shape index: {}]   ;;  %s2604_s3 = inlined_call_operand.vmem [shape: f32[2,1,128], index: 3, kind: input, shape index: {}]   ;;  %s2605_s4 = inlined_call_operand.hbm [shape: bf16[128,128], index: 4, kind: input, shape index: {}]   ;;  %s2606_s5 = inlined_call_operand.vmem [shape: f32[1,128], index: 5, kind: input, shape index: {}]   ;;  %s2607_s6 = inlined_call_operand.hbm [shape: bf16[2,16,128], index: 6, kind: output, shape index: {0}]   ;;  %s2608_s7 = inlined_call_operand.hbm [shape: f32[2,1,128], index: 7, kind: output, shape index: {1}]   ;;  %s2609_s8 = inlined_call_operand.hbm [shape: f32[2,1,128], index: 8, kind: output, shape index: {2}]  }
   0x1   :  { %2635 = sst [smem:[#allocation26_spill]] %s2602_s1 }
   0x2   :  { %2636 = sst [smem:[#allocation27_spill]] %s2607_s6 }
   0x3   :  { %2637 = sst [smem:[#allocation28_spill]] %s2608_s7 }
   0x4   :  { %2638 = sst [smem:[#allocation29_spill]] %s2609_s8 }
   0x5   :  { %14 = vsyncpa [#allocation3], 0 }
   0x6   :  { %16 = vsyncpa [#allocation3 + $0x1], 0 }
   0x7   :  { %17 = vsyncpa [#allocation6], 0 }
   0x8   :  { %19 = vsyncpa [#allocation6 + $0x1], 0 }
   0x9   :  { %20 = vsyncpa [#allocation9], 0 }
   0xa   :  { %21 = vsyncpa [#allocation4], 0 }
   0xb   :  { %23 = vsyncpa [#allocation4 + $0x1], 0 }
   0xc   :  { %24 = vsyncpa [#allocation12], 0 }
   0xd   :  { %26 = vsyncpa [#allocation12 + $0x1], 0  ;;  %s2093_s27 = smov 0   ;;  %s2095_s28 = smov 0  }
   0xe   :  { %s2097_s29 = smov 0   ;;  %s2099_s30 = smov 0  }
   0xf   :  { %s2101_s9 = smov 0   ;;  %s2103_s10 = smov 0  }
  0x10 LB: > { %2639 = sst [smem:[#allocation19_spill]] %s2013_s27  ;;  %s44_s11 = sadd.s32 1, %s2029_s9  ;;  %s2033_s10 = sphi %s2103_s10, %s32_s10   ;;  %s2029_s9 = sphi %s2101_s9, %s2678_s9   ;;  %s2025_s30 = sphi %s2099_s30, %s2677_s30   ;;  %s2021_s29 = sphi %s2097_s29, %s2676_s29   ;;  %s2017_s28 = sphi %s2095_s28, %s2680_s28   ;;  %s2013_s27 = sphi %s2093_s27, %s2679_s27  }
  0x11   : > { %2640 = sst [smem:[#allocation20_spill]] %s2021_s29  ;;  %s53_s12 = sadd.s32 1, %s2021_s29 }
  0x12   : > { %2641 = sst [smem:[#allocation21_spill]] %s2029_s9  ;;  %p46_p0 = scmp.ge.s32.totalorder %s44_s11, 2 }
  0x13   : > { %2642 = sst [smem:[#allocation22_spill]] %s2033_s10  ;;  %p2611_p1 = scmp.ne.s32.totalorder %s2021_s29, %s2017_s28 }
  0x14   : > { %p61_p2 = scmp.eq.s32.totalorder %s2033_s10, 0  ;;  %s2682_s11 = smov (%p46_p0, %s44_s11), 0 }
  0x15   : > { %2643 = sst [smem:[#allocation23_spill]] %s2682_s11  ;;  %s48_s13 = ssub.s32 %s2029_s9, %s2682_s11 }
  0x16   : > { %p62_p3 = por %p61_p2, %p2611_p1  ;;  %p51_p5 = scmp.eq.s32.totalorder %s48_s13, 0 }
  0x17   : > { %p1650_p6 = scmp.lt.s32.totalorder %s2033_s10, 2  ;;  %s2138_s14 = sand.u32 1, %s2021_s29  }
  0x18   : > { %s329_s15 = sand.u32 1, %s2033_s10   ;;  %s2610_s18 = sshll.u32 %s2138_s14, 7 }
  0x19   : > { %s2142_s16 = scalar_select %p51_p5, %s2021_s29, %s53_s12  }
  0x1a   : > { %p2144_p7 = pnand %p1650_p6, %p62_p3  ;;  %s1450_s19 = sshll.u32 %s2029_s9, 11 }
  0x1b   : > { %2644 = sst [smem:[#allocation24_spill]] %s2142_s16  ;;  %s2646_s1 = sld [smem:[#allocation26_spill]] }
  0x1c   : > { %s2645_s17 = scalar_select %p2144_p7, 1, 0 }
  0x1d   : > { %s333_s23 = scalar_lea.vmem [#allocation5], %s2610_s18  ;;  %s2161_s25 = scalar_lea.sflag [#allocation6], %s329_s15 }
  0x1e   : > { %s340_s24 = sshll.u32 %s333_s23, 4  ;;  %p2167_p9 = pneg %p2144_p7  ;;  %s2159_s24 = int_to_ptr.vmem [resolvable:$true] %s340_s24 }
  0x20   : > { %s2647_s12 = scalar_select %p2167_p9, 1, 0 }
  0x21   : > { %s2155_s22 = scalar_lea.hbm %s2646_s1, %s1450_s19  ;;  %s1770_s21 = scalar_lea.hbm %s2646_s1, 4096 }
  0x22   : > { %s1765_s26 = scalar_lea.hbm %s2155_s22, 2048  ;;  %p1771_p12 = scmp.lt.u32.totalorder %s2155_s22, %s2646_s1 }
  0x23   : > { %p1766_p8 = scmp.ne.s32.totalorder %s2155_s22, %s1765_s26  ;;  %p1772_p13 = scmp.lt.u32.totalorder %s1770_s21, %s1765_s26 }
  0x24   : > { %p1774_p2 = scmp.lt.u32.totalorder %s1765_s26, %s2155_s22 }
  0x25   : > { %p1768_p10 = pnand %p2167_p9, %p1766_p8  ;;  %p1773_p0 = por %p1772_p13, %p1771_p12 }
  0x27   : > { %p1769_p11 = pneg %p1768_p10  ;;  %p1775_p3 = por %p1774_p2, %p1773_p0 }
  0x29   : > { %p1776_p5 = pnand %p1775_p3, %p1769_p11 }
  0x2b   : > { %1779 = shalt.err (!%p1776_p5)
}
  0x2c   : > { %s1780_s15 = scalar_lea.vmem %s2159_s24, 2048  ;;  %s2035_s13 = smov [#allocation5]  }
  0x2d   : > { %p1781_p6 = scmp.ne.s32.totalorder %s2159_s24, %s1780_s15  ;;  %s1785_s20 = sshll.u32 %s2035_s13, 4  ;;  %s1786_s20 = int_to_ptr.vmem [resolvable:$false] %s1785_s20 }
  0x2e   : > { %s1787_s18 = scalar_lea.vmem %s1786_s20, 4096  ;;  %p1788_p4 = scmp.lt.s32.totalorder %s2159_s24, %s1786_s20 }
  0x2f   : > { %p1783_p8 = pnand %p1781_p6, %p2167_p9  ;;  %p1789_p1 = scmp.lt.s32.totalorder %s1787_s18, %s1780_s15 }
  0x31   : > { %p1784_p10 = pneg %p1783_p8  ;;  %p1790_p12 = por %p1789_p1, %p1788_p4 }
  0x33   : > { %p1791_p13 = pnand %p1790_p12, %p1784_p10 }
  0x35   : > { %1794 = shalt.err (!%p1791_p13)
}
  0x36   : > { %s2614_s26 = smov 64   ;;  %s2616_s21 = smov 4  }
  0x37   : > { %1635 = dma.hbm_to_vmem [thread:$0]  (!%p2144_p7), %s2155_s22, 2048, %s2159_s24, %s2161_s25, %s2614_s26, %s2614_s26, %s2616_s21  }
  0x38   : > { %s2199_s13 = scalar_lea.hbm %s2603_s2, %s1450_s19  ;;  %s2648_s20 = sshll.u32 %s2138_s14, 7 }
  0x39   : > { %s354_s18 = scalar_lea.vmem [#allocation7], %s2648_s20  ;;  %s2204_s11 = sadd.s32 4294967295, %s2033_s10  }
  0x3a   : > { %s361_s1 = sshll.u32 %s354_s18, 4  ;;  %s2613_s16 = sadd.s32 4294967294, %s2033_s10   ;;  %s2236_s1 = int_to_ptr.vmem [resolvable:$true] %s361_s1 }
  0x3b   : > { %p66_p1 = scmp.ne.s32.totalorder %s2017_s28, %s2013_s27  ;;  %p2627_p4 = scmp.eq.s32.totalorder %s2204_s11, 0 }
  0x3c   : > { %p212_p11 = scmp.eq.s32.totalorder %s2204_s11, 1  ;;  %p218_p0 = scmp.eq.s32.totalorder %s2613_s16, 1 }
  0x3d   : > { %p1347_p2 = scmp.ge.s32.totalorder %s2033_s10, 1  ;;  %p2216_p3 = por %p2627_p4, %p66_p1 }
  0x3e   : > { %p2650_p5 = scmp.ne.s32.totalorder %s2021_s29, %s2017_s28  ;;  %p2227_p8 = por %p218_p0, %p66_p1 }
  0x3f   : > { %s2649_s19 = scalar_select %p2216_p3, 1, 0 }
  0x40   : > { %p2223_p6 = por %p212_p11, %p2650_p5  ;;  %p277_p10 = scmp.lt.s32.totalorder %s2033_s10, 3 }
  0x41   : > { %s2652_s24 = scalar_select %p2227_p8, 1, 0 }
  0x42   : > { %s2651_s22 = scalar_select %p2223_p6, 1, 0 }
  0x43   : > { %2653 = sst [smem:[#allocation25_spill]] %s2652_s24  ;;  %p2232_p12 = pnand %p1347_p2, %p277_p10 }
  0x44   : > { %s2038_s15 = smov [#allocation8]   ;;  %s1350_s18 = sshll.u32 %s2138_s14, 3 }
  0x45   : > { %s2654_s23 = scalar_select %p2232_p12, 1, 0 }
  0x46   : > { %s289_s20 = sshll.u32 %s2038_s15, 4  ;;  %p1625_p13 = pneg %p2232_p12  ;;  %s2238_s20 = int_to_ptr.vmem [resolvable:$true] %s289_s20 }
  0x47   : > { %s1449_s16 = sshll.u32 %s2029_s9, 7  ;;  %s310_s15 = scalar_lea.vmem [#allocation2], %s1350_s18 }
  0x48   : > { %p2246_p1 = pnand %p1625_p13, %p2627_p4  ;;  %s2253_s10 = scalar_lea.hbm %s2601_s0, %s1449_s16 }
  0x49   : > { %s319_s24 = sshll.u32 %s310_s15, 4  ;;  %s1795_s7 = scalar_lea.hbm %s2605_s4, 1024  ;;  %s2255_s24 = int_to_ptr.vmem [resolvable:$true] %s319_s24 }
  0x4a   : > { %p1796_p11 = scmp.ne.s32.totalorder %s2605_s4, %s1795_s7  ;;  %p1797_p0 = pneg %p2246_p1 }
  0x4b   : > { %p1802_p10 = scmp.lt.u32.totalorder %s1795_s7, %s2605_s4 }
  0x4c   : > { %p1798_p2 = pnand %p1797_p0, %p1796_p11 }
  0x4e   : > { %p1799_p5 = pneg %p1798_p2 }
  0x50   : > { %p1804_p13 = pnand %p1802_p10, %p1799_p5 }
  0x52   : > { %1807 = shalt.err (!%p1804_p13)
}
  0x53   : > { %s1808_s16 = scalar_lea.vmem %s2238_s20, 1024  ;;  %p1816_p3 = scmp.lt.s32.totalorder %s2238_s20, %s2238_s20 }
  0x54   : > { %p1809_p4 = scmp.ne.s32.totalorder %s2238_s20, %s1808_s16  ;;  %p1817_p12 = scmp.lt.s32.totalorder %s1808_s16, %s1808_s16 }
  0x56   : > { %p1811_p8 = pnand %p1809_p4, %p1797_p0  ;;  %p1818_p7 = por %p1817_p12, %p1816_p3 }
  0x58   : > { %p1812_p6 = pneg %p1811_p8 }
  0x5a   : > { %p1819_p9 = pnand %p1818_p7, %p1812_p6 }
  0x5c   : > { %1822 = shalt.err (!%p1819_p9)
}
  0x5d   : > { %s2656_s6 = smov 4   ;;  %s2657_s8 = smov 64  }
  0x5e   : > { %1628 = dma.hbm_to_vmem [thread:$0]  (!%p2246_p1), %s2605_s4, 1024, %s2238_s20, [#allocation9], %s2657_s8, %s2657_s8, %s2656_s6  }
  0x5f   : > { %s307_s9 = scalar_lea.sflag [#allocation3], %s2138_s14  ;;  %s1823_s18 = scalar_lea.hbm %s2253_s10, 128 }
  0x60   : > { %p1824_p7 = scmp.ne.s32.totalorder %s2253_s10, %s1823_s18  ;;  %p2658_p9 = scmp.ne.s32.totalorder %s2647_s12, 0 }
  0x61   : > { %s1828_s29 = scalar_lea.hbm %s2601_s0, 256  ;;  %p1829_p6 = scmp.lt.u32.totalorder %s2253_s10, %s2601_s0 }
  0x62   : > { %p1826_p4 = pnand %p1824_p7, %p2658_p9  ;;  %p1830_p8 = scmp.lt.u32.totalorder %s1828_s29, %s1823_s18 }
  0x63   : > { %p1832_p11 = scmp.lt.u32.totalorder %s1823_s18, %s2253_s10 }
  0x64   : > { %p1827_p3 = pneg %p1826_p4  ;;  %p1831_p12 = por %p1830_p8, %p1829_p6 }
  0x66   : > { %p1833_p0 = por %p1832_p11, %p1831_p12 }
  0x68   : > { %p1834_p2 = pnand %p1833_p0, %p1827_p3 }
  0x6a   : > { %1837 = shalt.err (!%p1834_p2)
}
  0x6b   : > { %s1838_s20 = scalar_lea.vmem %s2255_s24, 128  ;;  %s2039_s7 = smov [#allocation2]  }
  0x6c   : > { %p1839_p1 = scmp.ne.s32.totalorder %s2255_s24, %s1838_s20  ;;  %s1843_s27 = sshll.u32 %s2039_s7, 4  ;;  %s1844_s27 = int_to_ptr.vmem [resolvable:$false] %s1843_s27 }
  0x6d   : > { %s1845_s26 = scalar_lea.vmem %s1844_s27, 256  ;;  %p1846_p13 = scmp.lt.s32.totalorder %s2255_s24, %s1844_s27 }
  0x6e   : > { %p1841_p5 = pnand %p1839_p1, %p2658_p9  ;;  %p1847_p7 = scmp.lt.s32.totalorder %s1845_s26, %s1838_s20 }
  0x70   : > { %p1842_p10 = pneg %p1841_p5  ;;  %p1848_p4 = por %p1847_p7, %p1846_p13 }
  0x72   : > { %p1849_p6 = pnand %p1848_p4, %p1842_p10 }
  0x74   : > { %1852 = shalt.err (!%p1849_p6)
}
  0x75   : > { %p2659_p3 = scmp.ne.s32.totalorder %s2645_s17, 0  ;;  %s1853_s18 = scalar_lea.hbm %s2199_s13, 2048 }
  0x76   : > { %p1854_p8 = scmp.ne.s32.totalorder %s2199_s13, %s1853_s18  ;;  %s1858_s21 = scalar_lea.hbm %s2603_s2, 4096 }
  0x77   : > { %1632 = dma.hbm_to_vmem [thread:$0]  (!%p2659_p3), %s2253_s10, 128, %s2255_s24, %s307_s9, %s2657_s8, %s2657_s8, %s2656_s6  }
  0x78   : > { %p1856_p12 = pnand %p1854_p8, %p2658_p9  ;;  %p1859_p0 = scmp.lt.u32.totalorder %s2199_s13, %s2603_s2 }
  0x79   : > { %p1860_p2 = scmp.lt.u32.totalorder %s1858_s21, %s1853_s18  ;;  %p1862_p5 = scmp.lt.u32.totalorder %s1853_s18, %s2199_s13 }
  0x7a   : > { %p1857_p11 = pneg %p1856_p12 }
  0x7b   : > { %p1861_p1 = por %p1860_p2, %p1859_p0 }
  0x7d   : > { %p1863_p10 = por %p1862_p5, %p1861_p1 }
  0x7f   : > { %p1864_p13 = pnand %p1863_p10, %p1857_p11 }
  0x81   : > { %1867 = shalt.err (!%p1864_p13)
}
  0x82   : > { %s1868_s10 = scalar_lea.vmem %s2236_s1, 2048  ;;  %s2040_s14 = smov [#allocation7]  }
  0x83   : > { %p1869_p7 = scmp.ne.s32.totalorder %s2236_s1, %s1868_s10  ;;  %s1873_s24 = sshll.u32 %s2040_s14, 4  ;;  %s1874_s24 = int_to_ptr.vmem [resolvable:$false] %s1873_s24 }
  0x84   : > { %s1875_s9 = scalar_lea.vmem %s1874_s24, 4096  ;;  %p1876_p8 = scmp.lt.s32.totalorder %s2236_s1, %s1874_s24 }
  0x85   : > { %p1871_p4 = pnand %p1869_p7, %p2658_p9  ;;  %p1877_p12 = scmp.lt.s32.totalorder %s1875_s9, %s1868_s10 }
  0x87   : > { %p1872_p6 = pneg %p1871_p4  ;;  %p1878_p0 = por %p1877_p12, %p1876_p8 }
  0x89   : > { %p1879_p2 = pnand %p1878_p0, %p1872_p6 }
  0x8b   : > { %1882 = shalt.err (!%p1879_p2)
}
  0x8c   : > { %1638 = dma.hbm_to_vmem [thread:$0]  (!%p2659_p3), %s2199_s13, 2048, %s2236_s1, %s2161_s25, %s2657_s8, %s2657_s8, %s2656_s6  }
  0x8d   : > { %p2660_p9 = scmp.ne.s32.totalorder %s2654_s23, 0 }
  0x8e   : > { %s2336_s12 = sand.u32 (!%p2660_p9), 1, %s2017_s28   ;;  %p2661_p11 = scmp.ne.s32.totalorder (!%p2660_p9), %s2649_s19, 0 }
  0x8f   : > { %379 = sbr.rel (%p2660_p9) target bundleno = 1256 (0x4e8), region = 44  ;;  %s1360_s7 = sshll.u32 (!%p2660_p9), %s2336_s12, 3 }
  0x90   : > { %s382_s27 = scalar_lea.sflag (!%p2660_p9), [#allocation3], %s2336_s12  ;;  %s2342_s17 = scalar_lea.vmem (!%p2660_p9), [#allocation2], %s1360_s7 }
  0x96   : > { %1992 = dma.done.wait (%p2661_p11), %s382_s27, 128  }
  0x97   : > { %1994 = vsyncadd (%p2661_p11), %s382_s27, 4294967168  ;;  %s390_s1 = sand.u32 1, %s2204_s11   ;;  %s1361_s25 = sshll.u32 %s2336_s12, 7 }
  0x98   : > { %s391_s13 = scalar_lea.sflag [#allocation6], %s390_s1  ;;  %s2352_s23 = scalar_lea.vmem [#allocation5], %s1361_s25 }
  0x99   : > { %1996 = dma.done.wait (%p2661_p11), %s391_s13, 4096  }
  0x9a   : > { %1998 = vsyncadd (%p2661_p11), %s391_s13, 4294963200  ;;  %s2358_s6 = scalar_lea.vmem [#allocation7], %s1361_s25  ;;  %p2662_p3 = scmp.eq.s32.totalorder %s2204_s11, 0 }
  0x9c   : > { %2000 = dma.done.wait (%p2662_p3), [#allocation9], 1024   ;;  %p2663_p1 = pmov %p2662_p3 }
  0x9d   : > { %v2041_v0 = vmov 0.0   ;;  %vm2042_vm0 = vmmov 0   ;;  %v1708_v1 = vld [vmem:[%s2352_s23] sm:$0xff]   ;;  %v1710_v3 = vld [vmem:[%s2352_s23 + $0x8] sm:$0xff]   ;;  %v1712_v5 = vld [vmem:[%s2352_s23 + $0x10] sm:$0xff]   ;;  %p462_p5 = scmp.lt.s32.totalorder %s2025_s30, 1 }
  0x9e   : > { %2002 = vsyncadd (%p2663_p1), [#allocation9], 4294966272  ;;  %1505 = vmatprep.subr.bf16.mxu0 %v2041_v0  ;;  %1525 = vmatprep.subr.bf16.mxu1 %v2041_v0  ;;  %v1709_v2 = vld [vmem:[%s2352_s23 + $0x40] sm:$0xff]   ;;  %v1711_v4 = vld [vmem:[%s2352_s23 + $0x48] sm:$0xff]   ;;  %s2461_s15 = scalar_lea.vmem [#allocation11], %s2336_s12  ;;  %s2466_s29 = scalar_lea.vmem [#allocation13], %s2336_s12 }
  0x9f   : > { %1521 = vmatprep.mubr.msk.bf16.mxu0 %vm2042_vm0, %v2041_v0  ;;  %1541 = vmatprep.mubr.msk.bf16.mxu1 %vm2042_vm0, %v2041_v0  ;;  %v1713_v6 = vld [vmem:[%s2352_s23 + $0x50] sm:$0xff]   ;;  %v1714_v7 = vld [vmem:[%s2352_s23 + $0x18] sm:$0xff]   ;;  %v1716_v9 = vld [vmem:[%s2352_s23 + $0x20] sm:$0xff]   ;;  %s463_s19 = scalar_select %p462_p5, %s2025_s30, 1  ;;  %1085 = vst [vmem:[%s2461_s15] sm:$0x1] %v2041_v0 }
  0xa0   : > { %1506 = vmatpush3.bf16.msra.mxu0 %v1708_v1  ;;  %1526 = vmatpush3.bf16.msra.mxu1 %v1709_v2  ;;  %v1715_v8 = vld [vmem:[%s2352_s23 + $0x58] sm:$0xff]   ;;  %v1717_v10 = vld [vmem:[%s2352_s23 + $0x60] sm:$0xff]   ;;  %v1718_v11 = vld [vmem:[%s2352_s23 + $0x28] sm:$0xff]   ;;  %1086 = vst [vmem:[%s2466_s29] sm:$0x1] %v2041_v0  ;;  %s1454_s20 = sshll.u32 %s2025_s30, 7  ;;  %s448_s10 = scalar_lea.vmem [#allocation10], %s1360_s7 }
  0xa1   : > { %1507 = vmatprep.subr.bf16.mxu0 %v2041_v0  ;;  %1527 = vmatprep.subr.bf16.mxu1 %v2041_v0  ;;  %v1719_v12 = vld [vmem:[%s2352_s23 + $0x68] sm:$0xff]   ;;  %v1720_v13 = vld [vmem:[%s2352_s23 + $0x30] sm:$0xff]   ;;  %v1722_v15 = vld [vmem:[%s2352_s23 + $0x38] sm:$0xff]   ;;  %s464_s18 = scalar_lea.vmem %s2604_s3, %s463_s19  ;;  %s1117_s14 = sshll.u32 %s448_s10, 4  ;;  %s2481_s14 = int_to_ptr.vmem [resolvable:$true] %s1117_s14 }
  0xa2   : > { %v1721_v14 = vld [vmem:[%s2352_s23 + $0x70] sm:$0xff]   ;;  %v1723_v16 = vld [vmem:[%s2352_s23 + $0x78] sm:$0xff]   ;;  %v1725_v31 = vld [vmem:[%s2358_s6 + $0x40] sm:$0xff]   ;;  %s2664_s27 = sld [smem:[#allocation27_spill]]  ;;  %s1094_s7 = scalar_lea.sflag [#allocation4], %s2336_s12 }
  0xa3   : > { %v1724_v17 = vld [vmem:[%s2342_s17] sm:$0xff]   ;;  %v1726_v32 = vld [vmem:[%s2358_s6 + $0x48] sm:$0xff]   ;;  %v1729_v51 = vld [vmem:[%s2358_s6 + $0x60] sm:$0xff]   ;;  %s1883_s13 = scalar_lea.vmem %s2481_s14, 128  ;;  %p2666_p13 = scmp.ne.s32.totalorder %s2651_s22, 0 }
  0xa4   : > { %1508 = vmatpush3.bf16.msra.mxu0 %v1710_v3  ;;  %1528 = vmatpush3.bf16.msra.mxu1 %v1711_v4  ;;  %v1365_v18 = vld [vmem:[%s464_s18] ss:$0 sm:$0xff]  ;;  %v1728_v50 = vld [vmem:[%s2358_s6 + $0x58] sm:$0xff]   ;;  %v1730_v52 = vld [vmem:[%s2358_s6 + $0x68] sm:$0xff]   ;;  %p1884_p10 = scmp.ne.s32.totalorder %s2481_s14, %s1883_s13  ;;  %s2043_s23 = smov [#allocation10]  }
  0xa5   : > { %1509 = vmatprep.subr.bf16.mxu0 %v2041_v0  ;;  %1529 = vmatprep.subr.bf16.mxu1 %v2041_v0  ;;  %v1727_v33 = vld [vmem:[%s2358_s6 + $0x50] sm:$0xff]   ;;  %v1732_v54 = vld [vmem:[%s2358_s6 + $0x78] sm:$0xff]   ;;  %v1741_v55 = vld [vmem:[#allocation8] sm:$0xff]  }
  0xa6   : > { %v1731_v53 = vld [vmem:[%s2358_s6 + $0x70] sm:$0xff]   ;;  %v1742_v56 = vld [vmem:[#allocation8 + $0x8] sm:$0xff]   ;;  %v1744_v58 = vld [vmem:[#allocation8 + $0x18] sm:$0xff]   ;;  %p1885_p7 = pnand %p1884_p10, %p2666_p13 }
  0xa7   : > { %v1743_v57 = vld [vmem:[#allocation8 + $0x10] sm:$0xff]   ;;  %v1745_v59 = vld [vmem:[#allocation8 + $0x20] sm:$0xff]   ;;  %v1746_v60 = vld [vmem:[#allocation8 + $0x28] sm:$0xff]  }
  0xa8   : > { %1510 = vmatpush3.bf16.msra.mxu0 %v1712_v5  ;;  %1530 = vmatpush3.bf16.msra.mxu1 %v1713_v6  ;;  %v1747_v61 = vld [vmem:[#allocation8 + $0x30] sm:$0xff]   ;;  %v1733_v5 = vld [vmem:[%s2358_s6] sm:$0xff]   ;;  %s2665_s17 = smov %s2664_s27  ;;  %s2479_s25 = scalar_lea.hbm %s2664_s27, %s1454_s20 }
  0xa9   : > { %1511 = vmatprep.subr.bf16.mxu0 %v2041_v0  ;;  %1531 = vmatprep.subr.bf16.mxu1 %v2041_v0  ;;  %p1886_p4 = pneg %p1885_p7 }
  0xac   : > { %1512 = vmatpush3.bf16.msra.mxu0 %v1714_v7  ;;  %1532 = vmatpush3.bf16.msra.mxu1 %v1715_v8  ;;  %v1734_v7 = vld [vmem:[%s2358_s6 + $0x8] sm:$0xff]   ;;  %v1735_v8 = vld [vmem:[%s2358_s6 + $0x10] sm:$0xff]  }
  0xad   : > { %1513 = vmatprep.subr.bf16.mxu0 %v2041_v0  ;;  %1533 = vmatprep.subr.bf16.mxu1 %v2041_v0 }
  0xb0   : > { %1514 = vmatpush3.bf16.msra.mxu0 %v1716_v9  ;;  %1534 = vmatpush3.bf16.msra.mxu1 %v1717_v10  ;;  %v1736_v9 = vld [vmem:[%s2358_s6 + $0x18] sm:$0xff]  }
  0xb1   : > { %1515 = vmatprep.subr.bf16.mxu0 %v2041_v0  ;;  %1535 = vmatprep.subr.bf16.mxu1 %v2041_v0 }
  0xb4   : > { %1516 = vmatpush3.bf16.msra.mxu0 %v1718_v11  ;;  %1536 = vmatpush3.bf16.msra.mxu1 %v1719_v12  ;;  %v1737_v12 = vld [vmem:[%s2358_s6 + $0x20] sm:$0xff]  }
  0xb5   : > { %1517 = vmatprep.subr.bf16.mxu0 %v2041_v0  ;;  %1537 = vmatprep.subr.bf16.mxu1 %v2041_v0 }
  0xb8   : > { %1518 = vmatpush3.bf16.msra.mxu0 %v1720_v13  ;;  %1538 = vmatpush3.bf16.msra.mxu1 %v1721_v14  ;;  %v1738_v13 = vld [vmem:[%s2358_s6 + $0x28] sm:$0xff]   ;;  %v1739_v14 = vld [vmem:[%s2358_s6 + $0x30] sm:$0xff]  }
  0xb9   : > { %1519 = vmatprep.subr.bf16.mxu0 %v2041_v0  ;;  %1539 = vmatprep.subr.bf16.mxu1 %v2041_v0 }
  0xbc   : > { %1520 = vmatpush3.bf16.msra.mxu0 %v1722_v15  ;;  %1540 = vmatpush3.bf16.msra.mxu1 %v1723_v16 }
  0xbd   : > { %1545 = vmatprep.subr.bf16.mxu0 %v2041_v0  ;;  %1585 = vmatprep.subr.bf16.mxu1 %v2041_v0 }
  0xbf   : > { %1522 = vmatmul.mubr.bf16.vlgmr.msra.gmra.mrb[0].mxu0 %v1724_v17  ;;  %1542 = vmatmul.mubr.bf16.vlgmr.msra.gmra.mrb[0].mxu1 %v1724_v17  ;;  %v1740_v17 = vld [vmem:[%s2358_s6 + $0x38] sm:$0xff]   ;;  %s1887_s6 = sshll.u32 %s2043_s23, 4  ;;  %s1888_s6 = int_to_ptr.vmem [resolvable:$false] %s1887_s6 }
  0xc0   : > { %1561 = vmatprep.mubr.msk.bf16.mxu0 %vm2042_vm0, %v2041_v0  ;;  %1601 = vmatprep.mubr.msk.bf16.mxu1 %vm2042_vm0, %v2041_v0  ;;  %s1889_s19 = scalar_lea.vmem %s1888_s6, 256  ;;  %p1890_p6 = scmp.lt.s32.totalorder %s2481_s14, %s1888_s6 }
  0xc1   : > { %1546 = vmatpush3.bf16.msra.mxu0 %v1725_v31  ;;  %1586 = vmatpush3.bf16.msra.mxu1 %v1741_v55  ;;  %p1891_p8 = scmp.lt.s32.totalorder %s1889_s19, %s1883_s13 }
  0xc2   : > { %1547 = vmatprep.subr.bf16.mxu0 %v2041_v0  ;;  %1587 = vmatprep.subr.bf16.mxu1 %v2041_v0 }
  0xc3   : > { %p1892_p12 = por %p1891_p8, %p1890_p6 }
  0xc5   : > { %1548 = vmatpush3.bf16.msra.mxu0 %v1726_v32  ;;  %1588 = vmatpush3.bf16.msra.mxu1 %v1742_v56  ;;  %p1893_p0 = pnand %p1892_p12, %p1886_p4 }
  0xc6   : > { %1549 = vmatprep.subr.bf16.mxu0 %v2041_v0  ;;  %1589 = vmatprep.subr.bf16.mxu1 %v2041_v0 }
  0xc9   : > { %1550 = vmatpush3.bf16.msra.mxu0 %v1727_v33  ;;  %1590 = vmatpush3.bf16.msra.mxu1 %v1743_v57 }
  0xca   : > { %1551 = vmatprep.subr.bf16.mxu0 %v2041_v0  ;;  %1591 = vmatprep.subr.bf16.mxu1 %v2041_v0 }
  0xcd   : > { %1552 = vmatpush3.bf16.msra.mxu0 %v1728_v50  ;;  %1592 = vmatpush3.bf16.msra.mxu1 %v1744_v58 }
  0xce   : > { %1553 = vmatprep.subr.bf16.mxu0 %v2041_v0  ;;  %1593 = vmatprep.subr.bf16.mxu1 %v2041_v0 }
  0xd1   : > { %1554 = vmatpush3.bf16.msra.mxu0 %v1729_v51  ;;  %1594 = vmatpush3.bf16.msra.mxu1 %v1745_v59 }
  0xd2   : > { %1555 = vmatprep.subr.bf16.mxu0 %v2041_v0  ;;  %1595 = vmatprep.subr.bf16.mxu1 %v2041_v0 }
  0xd5   : > { %1556 = vmatpush3.bf16.msra.mxu0 %v1730_v52  ;;  %1596 = vmatpush3.bf16.msra.mxu1 %v1746_v60 }
  0xd6   : > { %1557 = vmatprep.subr.bf16.mxu0 %v2041_v0  ;;  %1597 = vmatprep.subr.bf16.mxu1 %v2041_v0 }
  0xd9   : > { %1558 = vmatpush3.bf16.msra.mxu0 %v1731_v53  ;;  %1598 = vmatpush3.bf16.msra.mxu1 %v1747_v61 }
  0xda   : > { %1559 = vmatprep.subr.bf16.mxu0 %v2041_v0  ;;  %1599 = vmatprep.subr.bf16.mxu1 %v2041_v0 }
  0xdd   : > { %1560 = vmatpush3.bf16.msra.mxu0 %v1732_v54 }
  0xde   : > { %1565 = vmatprep.subr.bf16.mxu0 %v2041_v0 }
 0x192   : > { %v596_v19 = vpop.f32.mrb[0].mxu0  ;;  %v738_v21 = vpop.f32.mrb[0].mxu1 }
 0x193   : > { %v597_v20 = vadd.f32 %v1365_v18, %v596_v19  ;;  %v1523_v22 = vpop.f32.mrb[1].mxu0  ;;  %v739_v23 = vadd.f32 %v1365_v18, %v738_v21  ;;  %v1543_v24 = vpop.f32.mrb[1].mxu1  ;;  %v1748_v21 = vld [vmem:[#allocation8 + $0x38] sm:$0xff]  }
 0x194   : > { %v599_v25 = vpop.f32.mrb[2].mxu0  ;;  %v741_v26 = vpop.f32.mrb[2].mxu1  ;;  %1600 = vmatpush3.bf16.msra.mxu1 %v1748_v21 }
 0x195   : > { %603 = vmax.xlane.f32.xlu1 %v597_v20  ;;  %v600_v27 = vadd.f32 %v1365_v18, %v599_v25  ;;  %v1524_v28 = vpop.f32.mrb[3].mxu0  ;;  %745 = vmax.xlane.f32.xlu0 %v739_v23  ;;  %v1544_v29 = vpop.f32.mrb[3].mxu1  ;;  %v742_v30 = vadd.f32 %v1365_v18, %v741_v26 }
 0x199   : > { %605 = vmax.xlane.f32.xlu1 %v600_v27  ;;  %747 = vmax.xlane.f32.xlu0 %v742_v30 }
 0x222   : > { %v604_v34 = vpop.xlane.xlu1 %603  ;;  %v746_v35 = vpop.xlane.xlu0 %745 }
 0x223   : > { %v607_v36 = vsub.f32 %v597_v20, %v604_v34  ;;  %v749_v37 = vsub.f32 %v739_v23, %v746_v35 }
 0x225   : > { %v751_v38 = vmul.f32 1.442695, %v749_v37  ;;  %v609_v40 = vmul.f32 1.442695, %v607_v36 }
 0x226   : > { %v606_v39 = vpop.xlane.xlu1 %605  ;;  %v748_v41 = vpop.xlane.xlu0 %747 }
 0x227   : > { %1749 = vpow2.f32 %v751_v38  ;;  %v750_v42 = vsub.f32 %v742_v30, %v748_v41  ;;  %v608_v43 = vsub.f32 %v600_v27, %v606_v39  ;;  %v1431_v27 = vld [vmem:[%s2606_s5] ss:$0 sm:$0xff] }
 0x228   : > { %1751 = vpow2.f32 %v609_v40 }
 0x229   : > { %v753_v44 = vmul.f32 1.442695, %v750_v42  ;;  %v611_v45 = vmul.f32 1.442695, %v608_v43 }
 0x22b   : > { %1753 = vpow2.f32 %v753_v44 }
 0x22c   : > { %1755 = vpow2.f32 %v611_v45 }
 0x231   : > { %v1750_v46 = vpop.eup %1749 }
 0x232   : > { %755 = vadd.xlane.f32.xlu0 %v1750_v46  ;;  %v2418_v47 = vpop.eup %1751 }
 0x235   : > { %v1754_v48 = vpop.eup %1753 }
 0x236   : > { %613 = vadd.xlane.f32.xlu0 %v2418_v47  ;;  %757 = vadd.xlane.f32.xlu1 %v1754_v48  ;;  %v2421_v49 = vpop.eup %1755 }
 0x23a   : > { %615 = vadd.xlane.f32.xlu1 %v2421_v49 }
 0x2bf   : > { %v756_v62 = vpop.xlane.xlu0 %755 }
 0x2c0   : > { %1757 = vrcp.f32 %v756_v62 }
 0x2c3   : > { %v758_v63 = vpop.xlane.xlu1 %757  ;;  %v614_v11 = vpop.xlane.xlu0 %613 }
 0x2c4   : > { %1759 = vrcp.f32 %v758_v63 }
 0x2c7   : > { %v616_v10 = vpop.xlane.xlu1 %615 }
 0x2c8   : > { %1761 = vrcp.f32 %v616_v10 }
 0x2c9   : > { %1763 = vrcp.f32 %v614_v11 }
 0x2ca   : > { %v1758_v1 = vpop.eup %1757 }
 0x2cb   : > { %v761_v3 = vmul.f32 %v1758_v1, %v1750_v46 }
 0x2ce   : > { %v1760_v2 = vpop.eup %1759 }
 0x2cf   : > { %v762_v4 = vmul.f32 %v1760_v2, %v1754_v48 }
 0x2d1   : > { %v763_v6 = vpack.c.bf16 %v762_v4, %v761_v3 }
 0x2d2   : > { %v1762_v15 = vpop.eup %1761 }
 0x2d3   : > { %1562 = vmatmul.mubr.bf16.vlgmr.msra.gmra.mrb[4].mxu0 %v763_v6  ;;  %v1764_v16 = vpop.eup %1763  ;;  %v620_v18 = vmul.f32 %v1762_v15, %v2421_v49 }
 0x2d4   : > { %1566 = vmatpush3.bf16.msra.mxu0 %v1733_v5  ;;  %1581 = vmatprep.mubr.msk.bf16.mxu0 %vm2042_vm0, %v2041_v0  ;;  %v619_v19 = vmul.f32 %v1764_v16, %v2418_v47 }
 0x2d5   : > { %1567 = vmatprep.subr.bf16.mxu0 %v2041_v0 }
 0x2d6   : > { %v621_v20 = vpack.c.bf16 %v620_v18, %v619_v19 }
 0x2d8   : > { %1568 = vmatpush3.bf16.msra.mxu0 %v1734_v7 }
 0x2d9   : > { %1569 = vmatprep.subr.bf16.mxu0 %v2041_v0 }
 0x2dc   : > { %1570 = vmatpush3.bf16.msra.mxu0 %v1735_v8 }
 0x2dd   : > { %1571 = vmatprep.subr.bf16.mxu0 %v2041_v0 }
 0x2e0   : > { %1572 = vmatpush3.bf16.msra.mxu0 %v1736_v9 }
 0x2e1   : > { %1573 = vmatprep.subr.bf16.mxu0 %v2041_v0 }
 0x2e4   : > { %1574 = vmatpush3.bf16.msra.mxu0 %v1737_v12 }
 0x2e5   : > { %1575 = vmatprep.subr.bf16.mxu0 %v2041_v0 }
 0x2e8   : > { %1576 = vmatpush3.bf16.msra.mxu0 %v1738_v13 }
 0x2e9   : > { %1577 = vmatprep.subr.bf16.mxu0 %v2041_v0 }
 0x2ec   : > { %1578 = vmatpush3.bf16.msra.mxu0 %v1739_v14 }
 0x2ed   : > { %1579 = vmatprep.subr.bf16.mxu0 %v2041_v0 }
 0x2f0   : > { %1580 = vmatpush3.bf16.msra.mxu0 %v1740_v17 }
 0x2f3   : > { %1582 = vmatmul.mubr.bf16.vlgmr.msra.gmra.mrb[4].mxu0 %v621_v20 }
 0x3c6   : > { %v935_v22 = vpop.f32.mrb[4].mxu0 }
 0x3c7   : > { %v1583_v23 = vpop.f32.mrb[5].mxu0 }
 0x3c8   : > { %v938_v24 = vpop.f32.mrb[6].mxu0 }
 0x3c9   : > { %v942_v25 = vpack.c.bf16 %v938_v24, %v935_v22  ;;  %v1584_v26 = vpop.f32.mrb[7].mxu0 }
 0x3cb   : > { %1602 = vmatmul.mubr.bf16.vlgmr.msra.gmra.mrb[4].mxu1 %v942_v25 }
 0x49e   : > { %v1048_v28 = vpop.f32.mrb[4].mxu1 }
 0x49f   : > { %v1049_v29 = vadd.f32 %v1431_v27, %v1048_v28  ;;  %v1603_v30 = vpop.f32.mrb[5].mxu1 }
 0x4a0   : > { %v1051_v31 = vpop.f32.mrb[6].mxu1 }
 0x4a1   : > { %v1052_v32 = vadd.f32 %v1431_v27, %v1051_v31  ;;  %v1604_v33 = vpop.f32.mrb[7].mxu1  ;;  %v1072_v0 = vmul.f32 %v1049_v29, %v1049_v29 }
 0x4a3   : > { %v1458_v34 = vpack.c.bf16 %v1052_v32, %v1049_v29  ;;  %v1065_v35 = vadd.f32 %v1052_v32, %v1049_v29  ;;  %v1073_v36 = vmul.f32 %v1052_v32, %v1052_v32 }
 0x4a5   : > { %1459 = vst [vmem:[%s448_s10] sm:$0xff] %v1458_v34   ;;  %v1066_v37 = vrot.slane %v1065_v35, 4  ;;  %v1074_v38 = vadd.f32 %v1073_v36, %v1072_v0 }
 0x4a6   : > { %1896 = shalt.err (!%p1893_p0)
}
 0x4a7   : > { %s1897_s8 = scalar_lea.hbm %s2479_s25, 128  ;;  %s1901_s21 = scalar_lea.hbm %s2665_s17, 256 }
 0x4a8   : > { %p1898_p2 = scmp.ne.s32.totalorder %s2479_s25, %s1897_s8  ;;  %p1902_p3 = scmp.lt.u32.totalorder %s2479_s25, %s2665_s17 }
 0x4a9   : > { %p1903_p1 = scmp.lt.u32.totalorder %s1901_s21, %s1897_s8  ;;  %p1905_p10 = scmp.lt.u32.totalorder %s1897_s8, %s2479_s25 }
 0x4aa   : > { %p1899_p9 = pnand %p1898_p2, %p2666_p13 }
 0x4ab   : > { %p1904_p5 = por %p1903_p1, %p1902_p3 }
 0x4ac   : > { %p1900_p11 = pneg %p1899_p9 }
 0x4ad   : > { %p1906_p7 = por %p1905_p10, %p1904_p5 }
 0x4af   : > { %p1907_p4 = pnand %p1906_p7, %p1900_p11 }
 0x4b1   : > { %1910 = shalt.err (!%p1907_p4)
}
 0x4b2   : > { %s2044_s10 = smov 64   ;;  %s2045_s24 = smov 4   ;;  %v1067_v39 = vadd.f32 %v1066_v37, %v1065_v35  ;;  %v1075_v40 = vrot.slane %v1074_v38, 4  ;;  %v1087_v47 = vld [vmem:[%s2461_s15] sm:$0x1] }
 0x4b3   : > { %1619 = dma.vmem_to_hbm [thread:$0]  (%p2666_p13), %s2481_s14, 128, %s2479_s25, %s1094_s7, %s2044_s10, %s2044_s10, %s2045_s24  }
 0x4b4   : > { %v1068_v41 = vrot.slane %v1067_v39, 2  ;;  %v1076_v42 = vadd.f32 %v1075_v40, %v1074_v38  ;;  %s1445_s9 = sshll.u32 %s2025_s30, 4  ;;  %s1133_s27 = sshll.u32 %s2461_s15, 4  ;;  %v1090_v50 = vld [vmem:[%s2466_s29] sm:$0x1]  ;;  %s2517_s27 = int_to_ptr.vmem [resolvable:$true] %s1133_s27 }
 0x4b5   : > { %s1146_s12 = sshll.u32 %s2466_s29, 4  ;;  %s2667_s7 = sld [smem:[#allocation28_spill]]  ;;  %s2525_s12 = int_to_ptr.vmem [resolvable:$true] %s1146_s12 }
 0x4b6   : > { %v1069_v43 = vadd.f32 %v1068_v41, %v1067_v39  ;;  %v1077_v44 = vrot.slane %v1076_v42, 2  ;;  %s2668_s6 = sld [smem:[#allocation29_spill]]  ;;  %s2529_s8 = scalar_lea.sflag [#allocation12], %s390_s1 }
 0x4b7   : > { %s1911_s26 = scalar_lea.vmem %s2517_s27, 16  ;;  %s2046_s18 = smov [#allocation11]  }
 0x4b8   : > { %v1070_v45 = vrot.slane %v1069_v43, 1  ;;  %v1078_v46 = vadd.f32 %v1077_v44, %v1076_v42  ;;  %p1912_p6 = scmp.ne.s32.totalorder %s2517_s27, %s1911_s26  ;;  %s1915_s21 = sshll.u32 %s2046_s18, 4  ;;  %s1916_s21 = int_to_ptr.vmem [resolvable:$false] %s1915_s21 }
 0x4b9   : > { %p1918_p0 = scmp.lt.s32.totalorder %s2517_s27, %s1916_s21 }
 0x4ba   : > { %v1071_v48 = vadd.f32 %v1070_v45, %v1069_v43  ;;  %v1079_v49 = vrot.slane %v1078_v46, 1  ;;  %p1913_p8 = pnand %p1912_p6, %p2666_p13 }
 0x4bb   : > { %s2515_s13 = scalar_lea.hbm %s2667_s7, %s1445_s9 }
 0x4bc   : > { %v1080_v51 = vadd.f32 %v1079_v49, %v1078_v46  ;;  %v1088_v52 = vadd.f32 %v1087_v47, %v1071_v48  ;;  %s2523_s19 = scalar_lea.hbm %s2668_s6, %s1445_s9  ;;  %p1914_p12 = pneg %p1913_p8 }
 0x4be   : > { %1089 = vst [vmem:[%s2461_s15] sm:$0x1] %v1088_v52  ;;  %v1091_v53 = vadd.f32 %v1090_v50, %v1080_v51  ;;  %s1917_s15 = scalar_lea.vmem %s1916_s21, 32 }
 0x4bf   : > { %p1919_p2 = scmp.lt.s32.totalorder %s1917_s15, %s1911_s26 }
 0x4c1   : > { %p1920_p9 = por %p1919_p2, %p1918_p0 }
 0x4c3   : > { %p1921_p11 = pnand %p1920_p9, %p1914_p12 }
 0x4c5   : > { %1924 = shalt.err (!%p1921_p11)
}
 0x4c6   : > { %s1925_s11 = scalar_lea.hbm %s2515_s13, 16  ;;  %s1929_s20 = scalar_lea.hbm %s2667_s7, 32 }
 0x4c7   : > { %p1926_p3 = scmp.ne.s32.totalorder %s2515_s13, %s1925_s11  ;;  %p1930_p10 = scmp.lt.u32.totalorder %s2515_s13, %s2667_s7 }
 0x4c8   : > { %p1931_p7 = scmp.lt.u32.totalorder %s1929_s20, %s1925_s11  ;;  %p1933_p6 = scmp.lt.u32.totalorder %s1925_s11, %s2515_s13 }
 0x4c9   : > { %p1927_p1 = pnand %p1926_p3, %p2666_p13 }
 0x4ca   : > { %p1932_p4 = por %p1931_p7, %p1930_p10 }
 0x4cb   : > { %p1928_p5 = pneg %p1927_p1 }
 0x4cc   : > { %p1934_p8 = por %p1933_p6, %p1932_p4 }
 0x4ce   : > { %p1935_p12 = pnand %p1934_p8, %p1928_p5 }
 0x4d0   : > { %1938 = shalt.err (!%p1935_p12)
}
 0x4d1   : > { %1620 = dma.vmem_to_hbm [thread:$0]  (%p2666_p13), %s2517_s27, 16, %s2515_s13, %s2529_s8   ;;  %1092 = vst [vmem:[%s2466_s29] sm:$0x1] %v1091_v53 }
 0x4d2   : > { %s1939_s9 = scalar_lea.vmem %s2525_s12, 16  ;;  %s2047_s14 = smov [#allocation13]  }
 0x4d3   : > { %p1940_p0 = scmp.ne.s32.totalorder %s2525_s12, %s1939_s9  ;;  %s1943_s25 = sshll.u32 %s2047_s14, 4  ;;  %s1944_s25 = int_to_ptr.vmem [resolvable:$false] %s1943_s25 }
 0x4d4   : > { %s1945_s30 = scalar_lea.vmem %s1944_s25, 32  ;;  %p1946_p11 = scmp.lt.s32.totalorder %s2525_s12, %s1944_s25 }
 0x4d5   : > { %p1941_p2 = pnand %p1940_p0, %p2666_p13  ;;  %p1947_p3 = scmp.lt.s32.totalorder %s1945_s30, %s1939_s9 }
 0x4d7   : > { %p1942_p9 = pneg %p1941_p2  ;;  %p1948_p1 = por %p1947_p3, %p1946_p11 }
 0x4d9   : > { %p1949_p5 = pnand %p1948_p1, %p1942_p9 }
 0x4db   : > { %1952 = shalt.err (!%p1949_p5)
}
 0x4dc   : > { %s1953_s29 = scalar_lea.hbm %s2523_s19, 16  ;;  %s1957_s23 = scalar_lea.hbm %s2668_s6, 32 }
 0x4dd   : > { %p1954_p10 = scmp.ne.s32.totalorder %s2523_s19, %s1953_s29  ;;  %p1958_p6 = scmp.lt.u32.totalorder %s2523_s19, %s2668_s6 }
 0x4de   : > { %p1959_p8 = scmp.lt.u32.totalorder %s1957_s23, %s1953_s29  ;;  %p1961_p0 = scmp.lt.u32.totalorder %s1953_s29, %s2523_s19 }
 0x4df   : > { %p1955_p7 = pnand %p1954_p10, %p2666_p13 }
 0x4e0   : > { %p1960_p12 = por %p1959_p8, %p1958_p6 }
 0x4e1   : > { %p1956_p4 = pneg %p1955_p7 }
 0x4e2   : > { %p1962_p2 = por %p1961_p0, %p1960_p12 }
 0x4e4   : > { %p1963_p9 = pnand %p1962_p2, %p1956_p4 }
 0x4e6   : > { %1966 = shalt.err (!%p1963_p9)
}
 0x4e7   : > { %1621 = dma.vmem_to_hbm [thread:$0]  (%p2666_p13), %s2525_s12, 16, %s2523_s19, %s2529_s8  }
 0x4e8 PF: > { %s2669_s21 = sld [smem:[#allocation19_spill]]  ;;  %s2670_s15 = sld [smem:[#allocation25_spill]] }
 0x4e9   : > { %s2671_s11 = sld [smem:[#allocation22_spill]] }
 0x4ee   : > { %s1158_s1 = sand.u32 1, %s2669_s21   ;;  %p2672_p11 = scmp.ne.s32.totalorder %s2670_s15, 0 }
 0x4ef   : > { %p2673_p3 = scmp.ge.s32.totalorder %s2671_s11, 2  ;;  %s1159_s16 = scalar_lea.sflag [#allocation4], %s1158_s1 }
 0x4f1   : > { %p1640_p1 = pnand %p2673_p3, %p2672_p11 }
 0x4f3   : > { %2004 = dma.done.wait (!%p1640_p1), %s1159_s16, 128  }
 0x4f4   : > { %2006 = vsyncadd (!%p1640_p1), %s1159_s16, 4294967168  ;;  %s2674_s20 = sadd.s32 4294967294, %s2671_s11  }
 0x4f5   : > { %s1167_s10 = sand.u32 1, %s2674_s20  }
 0x4f6   : > { %s1168_s24 = scalar_lea.sflag [#allocation12], %s1167_s10 }
 0x4f7   : > { %2008 = dma.done.wait (!%p1640_p1), %s1168_s24, 32  }
 0x4f8   : > { %2010 = vsyncadd (!%p1640_p1), %s1168_s24, 4294967264  ;;  %s32_s10 = sadd.s32 1, %s2671_s11   ;;  %s2675_s22 = sld [smem:[#allocation20_spill]] }
 0x4f9   : > { %p29_p13 = scmp.ge.s32.totalorder %s32_s10, 4   ;;  %s2676_s29 = sld [smem:[#allocation24_spill]] }
 0x4fa   : > { %s2677_s30 = sld [smem:[#allocation21_spill]]  ;;  %s2678_s9 = sld [smem:[#allocation23_spill]] }
 0x4fb   : > { %s2679_s27 = smov %s2017_s28  ;;  %31 = sbr.rel (!%p29_p13) target bundleno = 16 (0x10), region = 158 }
 0x4fe   : > { %s2680_s28 = smov %s2675_s22 }
 0x502   :  { %1180 = vsyncpa [#allocation3], 1 }
 0x503   :  { %1182 = vsyncpa [#allocation3 + $0x1], 1 }
 0x504   :  { %1183 = vsyncpa [#allocation6], 1 }
 0x505   :  { %1185 = vsyncpa [#allocation6 + $0x1], 1 }
 0x506   :  { %1186 = vsyncpa [#allocation9], 1 }
 0x507   :  { %1187 = vsyncpa [#allocation4], 1 }
 0x508   :  { %1189 = vsyncpa [#allocation4 + $0x1], 1 }
 0x509   :  { %1190 = vsyncpa [#allocation12], 1 }
 0x50a   :  { %1192 = vsyncpa [#allocation12 + $0x1], 1 }

</bundles_post_ra>
